<compile_context>
chip_gen: v7x
topology: tpu7x:2x2x1
jax: 0.10.0
libtpu: 0.0.40
codegen_flags: <defaults>
</compile_context>

<pallas_src>
import functools

import jax
import jax.numpy as jnp
from jax.experimental import pallas as pl
from jax.experimental.pallas import tpu as pltpu


def _round_up(a, b):
    return ((a + b - 1) // b) * b


def _fused_mlp_kernel(*refs, n_layers, compute_dtype):
    # refs = (x_ref, w0, b0, w1, b1, ..., w_{L-1}, b_{L-1}, o_ref)
    x_ref = refs[0]
    o_ref = refs[-1]
    wb = refs[1:-1]

    h = x_ref[...].astype(jnp.float32)  # (tm, in_dim)
    for i in range(n_layers):
        w = wb[2 * i][...]          # (d_in_i, d_out_i), stored in compute_dtype
        b = wb[2 * i + 1][...]      # (1, d_out_i), f32
        h = jnp.dot(h.astype(compute_dtype), w,
                    preferred_element_type=jnp.float32)
        h = h + b.astype(jnp.float32)
        if i != n_layers - 1:
            h = jnp.maximum(h, 0.0)
    o_ref[...] = h.astype(o_ref.dtype)


def fused_mlp(x2d, params, *, out_dim, tm_max=8192,
              vmem_budget_bytes=48 << 20, compute_dtype=jnp.float32):
    """Run the full MLP on 2-D input x2d (M, in_dim) in a single Pallas kernel.

    params: list of (w, b) with w stored as (in_dim_i, out_dim_i), b as (out_dim_i,).
    Returns (M, out_dim) f32.
    """
    M, in_dim = x2d.shape
    n_layers = len(params)

    # ---- pad layer widths to multiples of 128 lanes (exact zero padding) ----
    # x keeps its natural width (its block covers the full last dim; padding x
    # would cost an extra wrapper-side HBM read+write of the whole input).
    widths_in = [in_dim] + [_round_up(params[i][1].shape[0], 128)
                            for i in range(n_layers - 1)]
    # Lane-dense output pad only when it costs at most ~2x extra write bytes.
    # TODO(synk): benchmark masked-store vs lane-dense output pad per chip.
    out_w = _round_up(out_dim, 128) if out_dim >= 64 else out_dim
    widths_out = [_round_up(params[i][1].shape[0], 128)
                  for i in range(n_layers - 1)] + [out_w]

    padded = []
    for i, (w, b) in enumerate(params):
        win, wout = widths_in[i], widths_out[i]
        w = jnp.pad(w, ((0, win - w.shape[0]), (0, wout - w.shape[1])))
        b = jnp.pad(b, (0, wout - b.shape[0])).reshape(1, -1)
        padded.append((w.astype(compute_dtype), b.astype(jnp.float32)))

    weight_bytes = sum(int(w.size) * w.dtype.itemsize +
                       int(b.size) * b.dtype.itemsize for w, b in padded)
    max_w = max([in_dim] + widths_out)

    # TODO(synk): if weight_bytes exceeds the residency budget (esp. v7x's
    # 64 MiB VMEM), stream the largest layer from HBM (memory_space=pl.ANY +
    # pltpu.emit_pipeline) or switch weights to bf16 instead of keeping all
    # weights resident.

    # ---- tm from a VMEM byte budget, balanced tiles, >= 2 grid steps --------
    # per-row bytes: double-buffered x tile + double-buffered out tile
    # + ~2 activation temporaries at the widest layer (compiler-managed VMEM).
    bytes_per_row = 4 * (2 * in_dim + 2 * out_w + 2 * max_w)
    avail = max(vmem_budget_bytes - 2 * weight_bytes, 1 << 20)
    tm_cap = max(8, min(tm_max, (avail // bytes_per_row) // 8 * 8))
    n_tiles = max(2, pl.cdiv(M, tm_cap))   # keep both v7x TensorCores busy
    tm = min(tm_cap, _round_up(pl.cdiv(M, n_tiles), 8))
    grid = (pl.cdiv(M, tm),)               # no row pad of x: last tile masked

    # ---- explicit VMEM limit (default scoped limit is only 16/32 MiB) ------
    act_bytes = 2 * tm * max_w * 4
    tile_bytes = 2 * tm * in_dim * 4 + 2 * tm * out_w * 4
    need = 2 * weight_bytes + tile_bytes + act_bytes
    vmem_limit = int(min(max(2 * need + (8 << 20), 32 << 20), 64 << 20))

    # ---- advisory cost estimate --------------------------------------------
    flops = sum(2 * M * w.shape[0] * w.shape[1] for w, _ in padded)
    bytes_accessed = int(M * in_dim * x2d.dtype.itemsize
                         + M * out_w * 4 + weight_bytes)
    cost = pl.CostEstimate(flops=flops, transcendentals=0,
                           bytes_accessed=bytes_accessed)

    kernel = functools.partial(_fused_mlp_kernel, n_layers=n_layers,
                               compute_dtype=compute_dtype)

    def _run(weight_mode):
        in_specs = [pl.BlockSpec((tm, in_dim), lambda i: (i, 0))]
        flat_args = [x2d]
        for w, b in padded:
            kw, kn = w.shape
            if weight_mode is None:
                wspec = pl.BlockSpec((kw, kn), lambda i: (0, 0))
                bspec = pl.BlockSpec((1, kn), lambda i: (0, 0))
            else:
                wspec = pl.BlockSpec((kw, kn), lambda i: (0, 0),
                                     pipeline_mode=weight_mode)
                bspec = pl.BlockSpec((1, kn), lambda i: (0, 0),
                                     pipeline_mode=weight_mode)
            in_specs += [wspec, bspec]
            flat_args += [w, b]
        out_specs = pl.BlockSpec((tm, out_w), lambda i: (i, 0))
        call = pl.pallas_call(
            kernel,
            out_shape=jax.ShapeDtypeStruct((M, out_w), jnp.float32),
            grid_spec=pltpu.PrefetchScalarGridSpec(
                num_scalar_prefetch=0,
                grid=grid,
                in_specs=in_specs,
                out_specs=out_specs,
            ),
            compiler_params=pltpu.CompilerParams(
                dimension_semantics=("parallel",),
                vmem_limit_bytes=vmem_limit,
            ),
            cost_estimate=cost,
        )
        return call(*flat_args)

    try:
        # Resident weights never change across the grid -> single buffer halves
        # their VMEM footprint (buys larger tm, fits v7x's 64 MiB).
        out = _run(pl.Buffered(1))
    except Exception:
        # This JAX build rejects buffer_count=1: fall back to default
        # double-buffering (2x weight VMEM, still correct).
        out = _run(None)

    if out_w != out_dim:
        out = out[:, :out_dim]
    return out


def init_mlp_params(key, in_dim, out_dim, hidden_list):
    """Deterministic init matching nn.Linear's uniform(-1/sqrt(fan_in), +) bounds."""
    dims = [in_dim] + list(hidden_list) + [out_dim]
    params = []
    for i in range(len(dims) - 1):
        fan_in, fan_out = dims[i], dims[i + 1]
        key, kw, kb = jax.random.split(key, 3)
        bound = 1.0 / jnp.sqrt(fan_in)
        # stored as (in, out) so the kernel computes x @ W directly
        w = jax.random.uniform(kw, (fan_in, fan_out), jnp.float32, -bound, bound)
        b = jax.random.uniform(kb, (fan_out,), jnp.float32, -bound, bound)
        params.append((w, b))
    return params


def mlp_forward(params, x):
    """Mirrors MLP.forward: flatten leading dims, run fused kernel, restore shape."""
    lead_shape = x.shape[:-1]
    h = x.reshape(-1, x.shape[-1])
    out_dim = params[-1][1].shape[0]
    y = fused_mlp(h, params, out_dim=out_dim)
    return y.reshape(*lead_shape, -1)


def mlp_forward_ref(params, x):
    """Pure-JAX reference for correctness checking."""
    lead_shape = x.shape[:-1]
    h = x.reshape(-1, x.shape[-1])
    n_layers = len(params)
    for idx, (w, b) in enumerate(params):
        h = h @ w + b
        if idx != n_layers - 1:
            h = jnp.maximum(h, 0.0)
    return h.reshape(*lead_shape, -1)


if __name__ == "__main__":
    key = jax.random.PRNGKey(0)
    k_params, k_x = jax.random.split(key)

    in_dim = 32
    hidden_list = [64, 64]
    out_dim = 16
    # seq=7 -> flattened M=14 (not a multiple of 8) to exercise the masked
    # boundary tile (no wrapper-side row pad).
    batch, seq = 2, 7

    params = init_mlp_params(k_params, in_dim, out_dim, hidden_list)
    x = jax.random.normal(k_x, (batch, seq, in_dim), jnp.float32)

    out = mlp_forward(params, x)
    out = jax.block_until_ready(out)

    ref = mlp_forward_ref(params, x)
    assert out.shape == (batch, seq, out_dim), out.shape
    assert jnp.allclose(out, ref, atol=1e-5, rtol=1e-5), "mismatch vs reference"

    print("KERNEL_OK")
</pallas_src>

<mosaic_0001>
module attributes {stable_mosaic.version = 11 : i64} {
  func.func @_fused_mlp_kernel(%arg0: i32, %arg1: memref<8x32xf32, #tpu.memory_space<vmem>>, %arg2: memref<32x128xf32, #tpu.memory_space<vmem>>, %arg3: memref<1x128xf32, #tpu.memory_space<vmem>>, %arg4: memref<128x128xf32, #tpu.memory_space<vmem>>, %arg5: memref<1x128xf32, #tpu.memory_space<vmem>>, %arg6: memref<128x16xf32, #tpu.memory_space<vmem>>, %arg7: memref<1x16xf32, #tpu.memory_space<vmem>>, %arg8: memref<8x16xf32, #tpu.memory_space<vmem>>) attributes {dimension_semantics = [#tpu.dimension_semantics<parallel>], iteration_bounds = array<i64: 2>, scalar_prefetch = 0 : i64, scratch_operands = 0 : i64, tpu.core_type = #tpu.core_type<tc>, window_params = [{transform_indices = @transform_0, window_bounds = array<i64: 8, 32>}, {pipeline_mode = #tpu.pipeline_mode<synchronous>, transform_indices = @transform_1, window_bounds = array<i64: 32, 128>}, {pipeline_mode = #tpu.pipeline_mode<synchronous>, transform_indices = @transform_2, window_bounds = array<i64: 1, 128>}, {pipeline_mode = #tpu.pipeline_mode<synchronous>, transform_indices = @transform_3, window_bounds = array<i64: 128, 128>}, {pipeline_mode = #tpu.pipeline_mode<synchronous>, transform_indices = @transform_4, window_bounds = array<i64: 1, 128>}, {pipeline_mode = #tpu.pipeline_mode<synchronous>, transform_indices = @transform_5, window_bounds = array<i64: 128, 16>}, {pipeline_mode = #tpu.pipeline_mode<synchronous>, transform_indices = @transform_6, window_bounds = array<i64: 1, 16>}, {transform_indices = @transform_7, window_bounds = array<i64: 8, 16>}]} {
    %c0 = arith.constant 0 : index
    %c0_0 = arith.constant 0 : index
    %0 = vector.load %arg1[%c0, %c0_0] : memref<8x32xf32, #tpu.memory_space<vmem>>, vector<8x32xf32>
    %c0_1 = arith.constant 0 : index
    %c0_2 = arith.constant 0 : index
    %1 = vector.load %arg2[%c0_1, %c0_2] : memref<32x128xf32, #tpu.memory_space<vmem>>, vector<32x128xf32>
    %c0_3 = arith.constant 0 : index
    %c0_4 = arith.constant 0 : index
    %2 = vector.load %arg3[%c0_3, %c0_4] : memref<1x128xf32, #tpu.memory_space<vmem>>, vector<1x128xf32>
    %cst = arith.constant dense<0.000000e+00> : vector<8x128xf32>
    %3 = tpu.matmul %0, %1, %cst {dimension_numbers = #tpu.dot_dimension_numbers<[1], [0], [0], [1], [0, 0, 1, 1], [], []>} : vector<8x32xf32>, vector<32x128xf32>, vector<8x128xf32> -> vector<8x128xf32>
    %4 = vector.broadcast %2 : vector<1x128xf32> to vector<8x128xf32>
    %5 = arith.addf %3, %4 : vector<8x128xf32>
    %cst_5 = arith.constant 0.000000e+00 : f32
    %6 = vector.broadcast %cst_5 : f32 to vector<8x128xf32>
    %7 = arith.maximumf %5, %6 : vector<8x128xf32>
    %c0_6 = arith.constant 0 : index
    %c0_7 = arith.constant 0 : index
    %8 = vector.load %arg4[%c0_6, %c0_7] : memref<128x128xf32, #tpu.memory_space<vmem>>, vector<128x128xf32>
    %c0_8 = arith.constant 0 : index
    %c0_9 = arith.constant 0 : index
    %9 = vector.load %arg5[%c0_8, %c0_9] : memref<1x128xf32, #tpu.memory_space<vmem>>, vector<1x128xf32>
    %cst_10 = arith.constant dense<0.000000e+00> : vector<8x128xf32>
    %10 = tpu.matmul %7, %8, %cst_10 {dimension_numbers = #tpu.dot_dimension_numbers<[1], [0], [0], [1], [0, 0, 1, 1], [], []>} : vector<8x128xf32>, vector<128x128xf32>, vector<8x128xf32> -> vector<8x128xf32>
    %11 = vector.broadcast %9 : vector<1x128xf32> to vector<8x128xf32>
    %12 = arith.addf %10, %11 : vector<8x128xf32>
    %cst_11 = arith.constant 0.000000e+00 : f32
    %13 = vector.broadcast %cst_11 : f32 to vector<8x128xf32>
    %14 = arith.maximumf %12, %13 : vector<8x128xf32>
    %c0_12 = arith.constant 0 : index
    %c0_13 = arith.constant 0 : index
    %15 = vector.load %arg6[%c0_12, %c0_13] : memref<128x16xf32, #tpu.memory_space<vmem>>, vector<128x16xf32>
    %c0_14 = arith.constant 0 : index
    %c0_15 = arith.constant 0 : index
    %16 = vector.load %arg7[%c0_14, %c0_15] : memref<1x16xf32, #tpu.memory_space<vmem>>, vector<1x16xf32>
    %cst_16 = arith.constant dense<0.000000e+00> : vector<8x16xf32>
    %17 = tpu.matmul %14, %15, %cst_16 {dimension_numbers = #tpu.dot_dimension_numbers<[1], [0], [0], [1], [0, 0, 1, 1], [], []>} : vector<8x128xf32>, vector<128x16xf32>, vector<8x16xf32> -> vector<8x16xf32>
    %18 = vector.broadcast %16 : vector<1x16xf32> to vector<8x16xf32>
    %19 = arith.addf %17, %18 : vector<8x16xf32>
    %c0_17 = arith.constant 0 : index
    %c0_18 = arith.constant 0 : index
    %20 = vector.load %arg8[%c0_17, %c0_18] : memref<8x16xf32, #tpu.memory_space<vmem>>, vector<8x16xf32>
    tpu.vector_store %arg8[%c0_17, %c0_18], %19 {strides = array<i32>} : memref<8x16xf32, #tpu.memory_space<vmem>>, vector<8x16xf32>,
    return
  }
  func.func @transform_0(%arg0: i32) -> (i32, i32) {
    %c0_i32 = arith.constant 0 : i32
    %c0_i32_0 = arith.constant 0 : i32
    return %arg0, %c0_i32 : i32, i32
  }
  func.func @transform_1(%arg0: i32) -> (i32, i32) {
    %c0_i32 = arith.constant 0 : i32
    %c0_i32_0 = arith.constant 0 : i32
    %c0_i32_1 = arith.constant 0 : i32
    return %c0_i32, %c0_i32_0 : i32, i32
  }
  func.func @transform_2(%arg0: i32) -> (i32, i32) {
    %c0_i32 = arith.constant 0 : i32
    %c0_i32_0 = arith.constant 0 : i32
    %c0_i32_1 = arith.constant 0 : i32
    return %c0_i32, %c0_i32_0 : i32, i32
  }
  func.func @transform_3(%arg0: i32) -> (i32, i32) {
    %c0_i32 = arith.constant 0 : i32
    %c0_i32_0 = arith.constant 0 : i32
    %c0_i32_1 = arith.constant 0 : i32
    return %c0_i32, %c0_i32_0 : i32, i32
  }
  func.func @transform_4(%arg0: i32) -> (i32, i32) {
    %c0_i32 = arith.constant 0 : i32
    %c0_i32_0 = arith.constant 0 : i32
    %c0_i32_1 = arith.constant 0 : i32
    return %c0_i32, %c0_i32_0 : i32, i32
  }
  func.func @transform_5(%arg0: i32) -> (i32, i32) {
    %c0_i32 = arith.constant 0 : i32
    %c0_i32_0 = arith.constant 0 : i32
    %c0_i32_1 = arith.constant 0 : i32
    return %c0_i32, %c0_i32_0 : i32, i32
  }
  func.func @transform_6(%arg0: i32) -> (i32, i32) {
    %c0_i32 = arith.constant 0 : i32
    %c0_i32_0 = arith.constant 0 : i32
    %c0_i32_1 = arith.constant 0 : i32
    return %c0_i32, %c0_i32_0 : i32, i32
  }
  func.func @transform_7(%arg0: i32) -> (i32, i32) {
    %c0_i32 = arith.constant 0 : i32
    %c0_i32_0 = arith.constant 0 : i32
    return %arg0, %c0_i32 : i32, i32
  }
}

module attributes {stable_mosaic.version = 11 : i64} {
  func.func @_fused_mlp_kernel(%arg0: i32, %arg1: memref<8x32xf32, #tpu.memory_space<vmem>>, %arg2: memref<32x128xf32, #tpu.memory_space<vmem>>, %arg3: memref<1x128xf32, #tpu.memory_space<vmem>>, %arg4: memref<128x128xf32, #tpu.memory_space<vmem>>, %arg5: memref<1x128xf32, #tpu.memory_space<vmem>>, %arg6: memref<128x16xf32, #tpu.memory_space<vmem>>, %arg7: memref<1x16xf32, #tpu.memory_space<vmem>>, %arg8: memref<8x16xf32, #tpu.memory_space<vmem>>) attributes {dimension_semantics = [#tpu.dimension_semantics<parallel>], iteration_bounds = array<i64: 2>, scalar_prefetch = 0 : i64, scratch_operands = 0 : i64, tpu.core_type = #tpu.core_type<tc>, window_params = [{transform_indices = @transform_0, window_bounds = array<i64: 8, 32>}, {pipeline_mode = #tpu.pipeline_mode<synchronous>, transform_indices = @transform_1, window_bounds = array<i64: 32, 128>}, {pipeline_mode = #tpu.pipeline_mode<synchronous>, transform_indices = @transform_2, window_bounds = array<i64: 1, 128>}, {pipeline_mode = #tpu.pipeline_mode<synchronous>, transform_indices = @transform_3, window_bounds = array<i64: 128, 128>}, {pipeline_mode = #tpu.pipeline_mode<synchronous>, transform_indices = @transform_4, window_bounds = array<i64: 1, 128>}, {pipeline_mode = #tpu.pipeline_mode<synchronous>, transform_indices = @transform_5, window_bounds = array<i64: 128, 16>}, {pipeline_mode = #tpu.pipeline_mode<synchronous>, transform_indices = @transform_6, window_bounds = array<i64: 1, 16>}, {transform_indices = @transform_7, window_bounds = array<i64: 8, 16>}]} {
    %c0 = arith.constant 0 : index
    %c0_0 = arith.constant 0 : index
    %0 = vector.load %arg1[%c0, %c0_0] : memref<8x32xf32, #tpu.memory_space<vmem>>, vector<8x32xf32>
    %c0_1 = arith.constant 0 : index
    %c0_2 = arith.constant 0 : index
    %1 = vector.load %arg2[%c0_1, %c0_2] : memref<32x128xf32, #tpu.memory_space<vmem>>, vector<32x128xf32>
    %c0_3 = arith.constant 0 : index
    %c0_4 = arith.constant 0 : index
    %2 = vector.load %arg3[%c0_3, %c0_4] : memref<1x128xf32, #tpu.memory_space<vmem>>, vector<1x128xf32>
    %cst = arith.constant dense<0.000000e+00> : vector<8x128xf32>
    %3 = tpu.matmul %0, %1, %cst {dimension_numbers = #tpu.dot_dimension_numbers<[1], [0], [0], [1], [0, 0, 1, 1], [], []>} : vector<8x32xf32>, vector<32x128xf32>, vector<8x128xf32> -> vector<8x128xf32>
    %4 = vector.broadcast %2 : vector<1x128xf32> to vector<8x128xf32>
    %5 = arith.addf %3, %4 : vector<8x128xf32>
    %cst_5 = arith.constant 0.000000e+00 : f32
    %6 = vector.broadcast %cst_5 : f32 to vector<8x128xf32>
    %7 = arith.maximumf %5, %6 : vector<8x128xf32>
    %c0_6 = arith.constant 0 : index
    %c0_7 = arith.constant 0 : index
    %8 = vector.load %arg4[%c0_6, %c0_7] : memref<128x128xf32, #tpu.memory_space<vmem>>, vector<128x128xf32>
    %c0_8 = arith.constant 0 : index
    %c0_9 = arith.constant 0 : index
    %9 = vector.load %arg5[%c0_8, %c0_9] : memref<1x128xf32, #tpu.memory_space<vmem>>, vector<1x128xf32>
    %cst_10 = arith.constant dense<0.000000e+00> : vector<8x128xf32>
    %10 = tpu.matmul %7, %8, %cst_10 {dimension_numbers = #tpu.dot_dimension_numbers<[1], [0], [0], [1], [0, 0, 1, 1], [], []>} : vector<8x128xf32>, vector<128x128xf32>, vector<8x128xf32> -> vector<8x128xf32>
    %11 = vector.broadcast %9 : vector<1x128xf32> to vector<8x128xf32>
    %12 = arith.addf %10, %11 : vector<8x128xf32>
    %cst_11 = arith.constant 0.000000e+00 : f32
    %13 = vector.broadcast %cst_11 : f32 to vector<8x128xf32>
    %14 = arith.maximumf %12, %13 : vector<8x128xf32>
    %c0_12 = arith.constant 0 : index
    %c0_13 = arith.constant 0 : index
    %15 = vector.load %arg6[%c0_12, %c0_13] : memref<128x16xf32, #tpu.memory_space<vmem>>, vector<128x16xf32>
    %c0_14 = arith.constant 0 : index
    %c0_15 = arith.constant 0 : index
    %16 = vector.load %arg7[%c0_14, %c0_15] : memref<1x16xf32, #tpu.memory_space<vmem>>, vector<1x16xf32>
    %cst_16 = arith.constant dense<0.000000e+00> : vector<8x16xf32>
    %17 = tpu.matmul %14, %15, %cst_16 {dimension_numbers = #tpu.dot_dimension_numbers<[1], [0], [0], [1], [0, 0, 1, 1], [], []>} : vector<8x128xf32>, vector<128x16xf32>, vector<8x16xf32> -> vector<8x16xf32>
    %18 = vector.broadcast %16 : vector<1x16xf32> to vector<8x16xf32>
    %19 = arith.addf %17, %18 : vector<8x16xf32>
    %c0_17 = arith.constant 0 : index
    %c0_18 = arith.constant 0 : index
    %20 = vector.load %arg8[%c0_17, %c0_18] : memref<8x16xf32, #tpu.memory_space<vmem>>, vector<8x16xf32>
    tpu.vector_store %arg8[%c0_17, %c0_18], %19 {strides = array<i32>} : memref<8x16xf32, #tpu.memory_space<vmem>>, vector<8x16xf32>,
    return
  }
  func.func @transform_0(%arg0: i32) -> (i32, i32) {
    %c0_i32 = arith.constant 0 : i32
    %c0_i32_0 = arith.constant 0 : i32
    return %arg0, %c0_i32 : i32, i32
  }
  func.func @transform_1(%arg0: i32) -> (i32, i32) {
    %c0_i32 = arith.constant 0 : i32
    %c0_i32_0 = arith.constant 0 : i32
    %c0_i32_1 = arith.constant 0 : i32
    return %c0_i32, %c0_i32_0 : i32, i32
  }
  func.func @transform_2(%arg0: i32) -> (i32, i32) {
    %c0_i32 = arith.constant 0 : i32
    %c0_i32_0 = arith.constant 0 : i32
    %c0_i32_1 = arith.constant 0 : i32
    return %c0_i32, %c0_i32_0 : i32, i32
  }
  func.func @transform_3(%arg0: i32) -> (i32, i32) {
    %c0_i32 = arith.constant 0 : i32
    %c0_i32_0 = arith.constant 0 : i32
    %c0_i32_1 = arith.constant 0 : i32
    return %c0_i32, %c0_i32_0 : i32, i32
  }
  func.func @transform_4(%arg0: i32) -> (i32, i32) {
    %c0_i32 = arith.constant 0 : i32
    %c0_i32_0 = arith.constant 0 : i32
    %c0_i32_1 = arith.constant 0 : i32
    return %c0_i32, %c0_i32_0 : i32, i32
  }
  func.func @transform_5(%arg0: i32) -> (i32, i32) {
    %c0_i32 = arith.constant 0 : i32
    %c0_i32_0 = arith.constant 0 : i32
    %c0_i32_1 = arith.constant 0 : i32
    return %c0_i32, %c0_i32_0 : i32, i32
  }
  func.func @transform_6(%arg0: i32) -> (i32, i32) {
    %c0_i32 = arith.constant 0 : i32
    %c0_i32_0 = arith.constant 0 : i32
    %c0_i32_1 = arith.constant 0 : i32
    return %c0_i32, %c0_i32_0 : i32, i32
  }
  func.func @transform_7(%arg0: i32) -> (i32, i32) {
    %c0_i32 = arith.constant 0 : i32
    %c0_i32_0 = arith.constant 0 : i32
    return %arg0, %c0_i32 : i32, i32
  }
}

</mosaic_0001>

<bundles_post_ra>
// kernel: tpu_custom_call.1
= control target key start
LH: loop header
LB: loop body
LE: loop exit
PB: predicated region body
PF: predicated region fallthrough
CT: control target
= control target key end

     0   :  { %12 = vsyncpa [#allocation3], 0  ;;  %s1299_s0 = inlined_call_operand.vmem [shape: f32[14,32], index: 0, kind: input, shape index: {}]   ;;  %s1300_s1 = inlined_call_operand.hbm [shape: f32[32,128], index: 1, kind: input, shape index: {}]   ;;  %s1301_s2 = inlined_call_operand.vmem [shape: f32[1,128], index: 2, kind: input, shape index: {}]   ;;  %s1302_s3 = inlined_call_operand.vmem [shape: f32[128,128], index: 3, kind: input, shape index: {}]   ;;  %s1303_s4 = inlined_call_operand.vmem [shape: f32[1,128], index: 4, kind: input, shape index: {}]   ;;  %s1304_s5 = inlined_call_operand.vmem [shape: f32[128,16], index: 5, kind: input, shape index: {}]   ;;  %s1305_s6 = inlined_call_operand.vmem [shape: f32[1,16], index: 6, kind: input, shape index: {}]   ;;  %s1306_s7 = inlined_call_operand.hbm [shape: f32[14,16], index: 7, kind: output, shape index: {}]  }
   0x1   :  { %13 = vsyncpa [#allocation4], 0 }
   0x2   :  { %15 = vsyncpa [#allocation4 + $0x1], 0  ;;  %s1038_s24 = smov 0   ;;  %s1040_s25 = smov 0  }
   0x3   :  { %s1042_s26 = smov 0   ;;  %s1044_s27 = smov 0  }
   0x4 LB: > { %s1059_s28 = sadd.s32 4294967295, %s989_s27   ;;  %s650_s29 = sadd.s32 4294967294, %s989_s27   ;;  %s989_s27 = sphi %s1044_s27, %s1322_s27   ;;  %s985_s26 = sphi %s1042_s26, %s1321_s26   ;;  %s981_s25 = sphi %s1040_s25, %s1320_s25   ;;  %s977_s24 = sphi %s1038_s24, %s1319_s24  }
   0x5   : > { %s1063_s30 = sadd.s32 1, %s989_s27   ;;  %s180_s8 = sadd.s32 1, %s985_s26 }
   0x6   : > { %s177_s9 = ssub.s32 %s989_s27, %s1063_s30  ;;  %p190_p0 = scmp.ne.s32.totalorder %s985_s26, %s981_s25 }
   0x7   : > { %p178_p1 = scmp.eq.s32.totalorder %s177_s9, 0  ;;  %p191_p2 = scmp.eq.s32.totalorder %s1059_s28, 1 }
   0x8   : > { %p196_p3 = scmp.ne.s32.totalorder %s981_s25, %s977_s24  ;;  %p197_p4 = scmp.eq.s32.totalorder %s650_s29, 1 }
   0x9   : > { %s1074_s10 = scalar_select %p178_p1, %s985_s26, %s180_s8  }
   0xa   : > { %p1076_p5 = por %p191_p2, %p190_p0  ;;  %p1080_p6 = por %p197_p4, %p196_p3 }
   0xb   : > { %p651_p7 = scmp.ge.s32.totalorder %s989_s27, 1  ;;  %p204_p8 = scmp.lt.s32.totalorder %s989_s27, 3 }
   0xc   : > { %s1310_s11 = scalar_select %p1076_p5, 1, 0 }
   0xd   : > { %s1311_s12 = scalar_select %p1080_p6, 1, 0 }
   0xe   : > { %p1307_p9 = scmp.eq.s32.totalorder %s1059_s28, 0  ;;  %p1087_p10 = pnand %p651_p7, %p204_p8 }
   0xf   : > { %s991_s14 = smov [#allocation2]   ;;  %s895_s19 = scalar_lea.hbm %s1300_s1, 512 }
  0x10   : > { %s1312_s13 = scalar_select %p1087_p10, 1, 0 }
  0x11   : > { %s216_s15 = sshll.u32 %s991_s14, 4  ;;  %p846_p11 = pneg %p1087_p10  ;;  %s217_s15 = int_to_ptr.vmem [resolvable:$true] %s216_s15 }
  0x12   : > { %p896_p13 = scmp.ne.s32.totalorder %s1300_s1, %s895_s19  ;;  %p902_p3 = scmp.lt.u32.totalorder %s895_s19, %s1300_s1 }
  0x13   : > { %p1095_p12 = pnand %p1307_p9, %p846_p11 }
  0x15   : > { %p897_p0 = pneg %p1095_p12 }
  0x17   : > { %p898_p1 = pnand %p897_p0, %p896_p13 }
  0x19   : > { %p899_p2 = pneg %p898_p1 }
  0x1b   : > { %p904_p4 = pnand %p902_p3, %p899_p2 }
  0x1d   : > { %907 = shalt.err (!%p904_p4)
}
  0x1e   : > { %s908_s29 = scalar_lea.vmem %s217_s15, 512  ;;  %p916_p9 = scmp.lt.s32.totalorder %s217_s15, %s217_s15 }
  0x1f   : > { %p909_p7 = scmp.ne.s32.totalorder %s217_s15, %s908_s29  ;;  %p917_p6 = scmp.lt.s32.totalorder %s908_s29, %s908_s29 }
  0x21   : > { %p911_p8 = pnand %p909_p7, %p897_p0  ;;  %p918_p5 = por %p917_p6, %p916_p9 }
  0x23   : > { %p912_p11 = pneg %p911_p8 }
  0x25   : > { %p919_p10 = pnand %p918_p5, %p912_p11 }
  0x27   : > { %922 = shalt.err (!%p919_p10)
}
  0x28   : > { %s992_s8 = smov 128   ;;  %s993_s9 = smov 8  }
  0x29   : > { %849 = dma.hbm_to_vmem [thread:$0]  (!%p1095_p12), %s1300_s1, 512, %s217_s15, [#allocation3], %s992_s8, %s992_s8, %s993_s9  }
  0x2a   : > { %p1314_p13 = scmp.ne.s32.totalorder %s1312_s13, 0 }
  0x2b   : > { %p1315_p1 = scmp.eq.s32.totalorder (!%p1314_p13), %s1059_s28, 0 }
  0x2c   : > { %254 = sbr.rel (%p1314_p13) target bundleno = 722 (0x2d2), region = 48 }
  0x33   : > { %968 = dma.done.wait (%p1315_p1), [#allocation3], 512   ;;  %p1316_p0 = pmov %p1315_p1 }
  0x34   : > { %p285_p5 = scmp.lt.s32.totalorder %s1059_s28, 1  ;;  %v994_v0 = vmov 0.0|0.0   ;;  %vm995_vm0 = vmmov 0   ;;  %v996_v1 = vmov 0.0   ;;  %v290_v2 = vld [vmem:[#allocation2] sm:$0xff]  ;;  %v291_v3 = vld [vmem:[#allocation2 + $0x8] sm:$0xff] }
  0x35   : > { %970 = vsyncadd (%p1316_p0), [#allocation3], 4294966784  ;;  %786 = vmatprep.subr.bf16.mxu0 %v994_v0  ;;  %713 = vmatprep.mubr.msk.f32.mxu0 %vm995_vm0, %v996_v1  ;;  %v292_v4 = vld [vmem:[#allocation2 + $0x10] sm:$0xff]  ;;  %v787_v5 = vpack.c.bf16 %v291_v3, %v290_v2  ;;  %v293_v6 = vld [vmem:[#allocation2 + $0x18] sm:$0xff]  ;;  %vm301_vm1 = vcmask 261120   ;;  %s663_s22 = sshll.u32 %s1059_s28, 7 }
  0x36   : > { %792 = vmatprep.subr.bf16.mxu1 %v994_v0  ;;  %748 = vmatprep.mubr.msk.f32.mxu1 %vm995_vm0, %v996_v1  ;;  %s286_s13 = scalar_select %p285_p5, %s1059_s28, 1  ;;  %v376_v7 = vld [vmem:[%s1302_s3] sm:$0xff]  ;;  %v377_v8 = vld [vmem:[%s1302_s3 + $0x8] sm:$0xff]  ;;  %v378_v9 = vld [vmem:[%s1302_s3 + $0x10] sm:$0xff]  ;;  %v790_v11 = vpack.c.bf16 %v293_v6, %v292_v4  ;;  %vm563_vm2 = vcmask 130048  }
  0x37   : > { %v379_v10 = vld [vmem:[%s1302_s3 + $0x18] sm:$0xff]  ;;  %788 = vmatpush3.bf16.msra.mxu0 %v787_v5  ;;  %v793_v12 = vpack.c.bf16 %v377_v8, %v376_v7  ;;  %v380_v14 = vld [vmem:[%s1302_s3 + $0x20] sm:$0xff]  ;;  %v381_v15 = vld [vmem:[%s1302_s3 + $0x28] sm:$0xff]  ;;  %p1317_p9 = scmp.ne.s32.totalorder %s1310_s11, 0  ;;  %s997_s28 = smov [#allocation5]  }
  0x38   : > { %s657_s15 = sshll.u32 %s286_s13, 3  ;;  %789 = vmatprep.subr.bf16.mxu0 %v994_v0  ;;  %v796_v13 = vpack.c.bf16 %v379_v10, %v378_v9  ;;  %v799_v17 = vpack.c.bf16 %v381_v15, %v380_v14  ;;  %v382_v18 = vld [vmem:[%s1302_s3 + $0x30] sm:$0xff]  ;;  %v383_v19 = vld [vmem:[%s1302_s3 + $0x38] sm:$0xff]  ;;  %v384_v21 = vld [vmem:[%s1302_s3 + $0x40] sm:$0xff]  ;;  %s927_s16 = sshll.u32 %s997_s28, 4  ;;  %s928_s16 = int_to_ptr.vmem [resolvable:$false] %s927_s16 }
  0x39   : > { %s288_s14 = scalar_lea.vmem %s1299_s0, %s657_s15  ;;  %794 = vmatpush3.bf16.msra.mxu1 %v793_v12  ;;  %v802_v20 = vpack.c.bf16 %v383_v19, %v382_v18  ;;  %v385_v22 = vld [vmem:[%s1302_s3 + $0x48] sm:$0xff]  ;;  %v386_v24 = vld [vmem:[%s1302_s3 + $0x50] sm:$0xff]  ;;  %v387_v25 = vld [vmem:[%s1302_s3 + $0x58] sm:$0xff]  ;;  %s282_s15 = sand.u32 1, %s981_s25  }
  0x3a   : > { %795 = vmatprep.subr.bf16.mxu1 %v994_v0  ;;  %v289_v16 = vld [vmem:[%s288_s14] sm:$0xff]  ;;  %v805_v23 = vpack.c.bf16 %v385_v22, %v384_v21  ;;  %v808_v26 = vpack.c.bf16 %v387_v25, %v386_v24  ;;  %v389_v28 = vld [vmem:[%s1302_s3 + $0x68] sm:$0xff]  ;;  %v390_v30 = vld [vmem:[%s1302_s3 + $0x70] sm:$0xff]  ;;  %s656_s19 = sshll.u32 %s282_s15, 3  ;;  %s1257_s14 = scalar_lea.hbm %s1306_s7, %s663_s22 }
  0x3b   : > { %791 = vmatpush3.bf16.msra.mxu0 %v790_v11  ;;  %v388_v27 = vld [vmem:[%s1302_s3 + $0x60] sm:$0xff]  ;;  %v391_v31 = vld [vmem:[%s1302_s3 + $0x78] sm:$0xff]  ;;  %v471_v34 = vld [vmem:[%s1304_s5 + $0x8] sm:$0xff]  ;;  %s284_s23 = scalar_lea.vmem [#allocation5], %s656_s19  ;;  %s566_s17 = scalar_lea.sflag [#allocation4], %s282_s15 }
  0x3c   : > { %816 = vmatprep.subr.bf16.mxu0 %v994_v0  ;;  %v811_v29 = vpack.c.bf16 %v389_v28, %v388_v27  ;;  %v814_v32 = vpack.c.bf16 %v391_v31, %v390_v30  ;;  %v470_v33 = vld [vmem:[%s1304_s5] sm:$0xff]  ;;  %v472_v35 = vld [vmem:[%s1304_s5 + $0x10] sm:$0xff]  ;;  %v473_v37 = vld [vmem:[%s1304_s5 + $0x18] sm:$0xff]  ;;  %s579_s29 = sshll.u32 %s284_s23, 4  ;;  %s929_s18 = scalar_lea.vmem %s928_s16, 256  ;;  %s1259_s29 = int_to_ptr.vmem [resolvable:$true] %s579_s29 }
  0x3d   : > { %797 = vmatpush3.bf16.msra.mxu1 %v796_v13  ;;  %v817_v36 = vpack.c.bf16 %v471_v34, %v470_v33  ;;  %v820_v38 = vpack.c.bf16 %v473_v37, %v472_v35  ;;  %v474_v39 = vld [vmem:[%s1304_s5 + $0x20] sm:$0xff]  ;;  %v475_v40 = vld [vmem:[%s1304_s5 + $0x28] sm:$0xff]  ;;  %v476_v42 = vld [vmem:[%s1304_s5 + $0x30] sm:$0xff]  ;;  %s923_s13 = scalar_lea.vmem %s1259_s29, 128  ;;  %p930_p2 = scmp.lt.s32.totalorder %s1259_s29, %s928_s16 }
  0x3e   : > { %714 = vmatmul.mubr.msk.f32.vlgmr.msra.gmra.mrb[0].mxu0 %vm301_vm1, %v289_v16  ;;  %798 = vmatprep.subr.bf16.mxu1 %v994_v0  ;;  %v823_v41 = vpack.c.bf16 %v475_v40, %v474_v39  ;;  %v477_v43 = vld [vmem:[%s1304_s5 + $0x38] sm:$0xff]  ;;  %v478_v45 = vld [vmem:[%s1304_s5 + $0x40] sm:$0xff]  ;;  %v479_v46 = vld [vmem:[%s1304_s5 + $0x48] sm:$0xff]  ;;  %p924_p6 = scmp.ne.s32.totalorder %s1259_s29, %s923_s13  ;;  %p931_p3 = scmp.lt.s32.totalorder %s929_s18, %s923_s13 }
  0x3f   : > { %783 = vmatprep.mubr.msk.f32.mxu0 %vm995_vm0, %v996_v1  ;;  %818 = vmatpush3.bf16.msra.mxu0 %v817_v36  ;;  %v826_v44 = vpack.c.bf16 %v477_v43, %v476_v42  ;;  %v829_v47 = vpack.c.bf16 %v479_v46, %v478_v45  ;;  %v480_v48 = vld [vmem:[%s1304_s5 + $0x50] sm:$0xff]  ;;  %v481_v49 = vld [vmem:[%s1304_s5 + $0x58] sm:$0xff]  ;;  %v482_v51 = vld [vmem:[%s1304_s5 + $0x60] sm:$0xff] }
  0x40   : > { %819 = vmatprep.subr.bf16.mxu0 %v994_v0  ;;  %v832_v50 = vpack.c.bf16 %v481_v49, %v480_v48  ;;  %v483_v52 = vld [vmem:[%s1304_s5 + $0x68] sm:$0xff]  ;;  %v658_v54 = vld [vmem:[%s1301_s2] ss:$0 sm:$0xff]  ;;  %v484_v59 = vld [vmem:[%s1304_s5 + $0x70] sm:$0xff]  ;;  %p925_p10 = pnand %p924_p6, %p1317_p9  ;;  %p932_p4 = por %p931_p3, %p930_p2 }
  0x41   : > { %800 = vmatpush3.bf16.msra.mxu1 %v799_v17  ;;  %v835_v53 = vpack.c.bf16 %v483_v52, %v482_v51  ;;  %v485_v60 = vld [vmem:[%s1304_s5 + $0x78] sm:$0xff]  ;;  %v660_v62 = vld [vmem:[%s1303_s4] ss:$0 sm:$0xff] }
  0x42   : > { %801 = vmatprep.subr.bf16.mxu1 %v994_v0  ;;  %v838_v61 = vpack.c.bf16 %v485_v60, %v484_v59  ;;  %v661_v3 = vld [vmem:[%s1305_s6] ss:$0 sm:$0xff]  ;;  %p926_p12 = pneg %p925_p10 }
  0x43   : > { %821 = vmatpush3.bf16.msra.mxu0 %v820_v38 }
  0x44   : > { %822 = vmatprep.subr.bf16.mxu0 %v994_v0  ;;  %p933_p7 = pnand %p932_p4, %p926_p12 }
  0x45   : > { %803 = vmatpush3.bf16.msra.mxu1 %v802_v20 }
  0x46   : > { %804 = vmatprep.subr.bf16.mxu1 %v994_v0 }
  0x47   : > { %824 = vmatpush3.bf16.msra.mxu0 %v823_v41 }
  0x48   : > { %825 = vmatprep.subr.bf16.mxu0 %v994_v0 }
  0x49   : > { %806 = vmatpush3.bf16.msra.mxu1 %v805_v23 }
  0x4a   : > { %807 = vmatprep.subr.bf16.mxu1 %v994_v0 }
  0x4b   : > { %827 = vmatpush3.bf16.msra.mxu0 %v826_v44 }
  0x4c   : > { %828 = vmatprep.subr.bf16.mxu0 %v994_v0 }
  0x4d   : > { %809 = vmatpush3.bf16.msra.mxu1 %v808_v26 }
  0x4e   : > { %810 = vmatprep.subr.bf16.mxu1 %v994_v0 }
  0x4f   : > { %830 = vmatpush3.bf16.msra.mxu0 %v829_v47 }
  0x50   : > { %831 = vmatprep.subr.bf16.mxu0 %v994_v0 }
  0x51   : > { %812 = vmatpush3.bf16.msra.mxu1 %v811_v29 }
  0x52   : > { %813 = vmatprep.subr.bf16.mxu1 %v994_v0 }
  0x53   : > { %833 = vmatpush3.bf16.msra.mxu0 %v832_v50 }
  0x54   : > { %834 = vmatprep.subr.bf16.mxu0 %v994_v0 }
  0x55   : > { %815 = vmatpush3.bf16.msra.mxu1 %v814_v32 }
  0x57   : > { %836 = vmatpush3.bf16.msra.mxu0 %v835_v53 }
  0x58   : > { %837 = vmatprep.subr.bf16.mxu0 %v994_v0 }
  0x5b   : > { %839 = vmatpush3.bf16.msra.mxu0 %v838_v61 }
 0x111   : > { %v371_v55 = vpop.f32.mrb[0].mxu0 }
 0x112   : > { %v372_v56 = vadd.f32 %v658_v54, %v371_v55  ;;  %v715_v57 = vpop.f32.mrb[1].mxu0 }
 0x114   : > { %v375_v58 = vmax.f32 %v372_v56, 0.0 }
 0x116   : > { %749 = vmatmul.mubr.f32.vlgmr.msra.gmra.mrb[0].mxu1 %v375_v58 }
 0x1e9   : > { %v465_v63 = vpop.f32.mrb[0].mxu1 }
 0x1ea   : > { %v466_v0 = vadd.f32 %v660_v62, %v465_v63  ;;  %v750_v1 = vpop.f32.mrb[1].mxu1 }
 0x1ec   : > { %v469_v2 = vmax.f32 %v466_v0, 0.0 }
 0x1ee   : > { %784 = vmatmul.mubr.f32.vlgmr.msra.gmra.mrb[2].mxu0 %v469_v2 }
 0x2c1   : > { %v559_v4 = vpop.f32.mrb[2].mxu0 }
 0x2c2   : > { %v560_v5 = vadd.f32 %v661_v3, %v559_v4  ;;  %v785_v6 = vpop.f32.mrb[3].mxu0 }
 0x2c4   : > { %564 = vst.msk [vmem:[%s284_s23] sm:$0xff] %vm563_vm2, %v560_v5 }
 0x2c5   : > { %936 = shalt.err (!%p933_p7)
}
 0x2c6   : > { %s937_s15 = scalar_lea.hbm %s1257_s14, 128  ;;  %s941_s21 = scalar_lea.hbm %s1306_s7, 256 }
 0x2c7   : > { %p938_p8 = scmp.ne.s32.totalorder %s1257_s14, %s937_s15  ;;  %p942_p1 = scmp.lt.u32.totalorder %s1257_s14, %s1306_s7 }
 0x2c8   : > { %p943_p0 = scmp.lt.u32.totalorder %s941_s21, %s937_s15  ;;  %p945_p6 = scmp.lt.u32.totalorder %s937_s15, %s1257_s14 }
 0x2c9   : > { %p939_p11 = pnand %p938_p8, %p1317_p9 }
 0x2ca   : > { %p944_p5 = por %p943_p0, %p942_p1 }
 0x2cb   : > { %p940_p13 = pneg %p939_p11 }
 0x2cc   : > { %p946_p10 = por %p945_p6, %p944_p5 }
 0x2ce   : > { %p947_p12 = pnand %p946_p10, %p940_p13 }
 0x2d0   : > { %950 = shalt.err (!%p947_p12)
}
 0x2d1   : > { %844 = dma.vmem_to_hbm [thread:$0]  (%p1317_p9), %s1259_s29, 128, %s1257_s14, %s566_s17  }
 0x2d2 PF: > { %p856_p2 = scmp.ge.s32.totalorder %s989_s27, 2  ;;  %s591_s8 = sand.u32 1, %s977_s24  }
 0x2d3   : > { %p1318_p3 = scmp.ne.s32.totalorder %s1311_s12, 0  ;;  %s592_s9 = scalar_lea.sflag [#allocation4], %s591_s8 }
 0x2d5   : > { %p851_p4 = pnand %p856_p2, %p1318_p3 }
 0x2d7   : > { %972 = dma.done.wait (!%p851_p4), %s592_s9, 128  }
 0x2d8   : > { %974 = vsyncadd (!%p851_p4), %s592_s9, 4294967168  ;;  %p18_p7 = scmp.ge.s32.totalorder %s1063_s30, 4   ;;  %s1319_s24 = smov %s981_s25 }
 0x2d9   : > { %s1320_s25 = smov %s985_s26  ;;  %s1321_s26 = smov %s1074_s10 }
 0x2da   : > { %s1322_s27 = smov %s1063_s30  ;;  %20 = sbr.rel (!%p18_p7) target bundleno = 4 (0x4), region = 88 }
 0x2e1   :  { %597 = vsyncpa [#allocation3], 1 }
 0x2e2   :  { %599 = vsyncpa [#allocation3 + $0x1], 1 }
 0x2e3   :  { %600 = vsyncpa [#allocation4], 1 }
 0x2e4   :  { %602 = vsyncpa [#allocation4 + $0x1], 1 }

// kernel: tpu_custom_call.1
= control target key start
LH: loop header
LB: loop body
LE: loop exit
PB: predicated region body
PF: predicated region fallthrough
CT: control target
= control target key end

     0   :  { %12 = vsyncpa [#allocation3], 0  ;;  %s1299_s0 = inlined_call_operand.vmem [shape: f32[14,32], index: 0, kind: input, shape index: {}]   ;;  %s1300_s1 = inlined_call_operand.hbm [shape: f32[32,128], index: 1, kind: input, shape index: {}]   ;;  %s1301_s2 = inlined_call_operand.vmem [shape: f32[1,128], index: 2, kind: input, shape index: {}]   ;;  %s1302_s3 = inlined_call_operand.vmem [shape: f32[128,128], index: 3, kind: input, shape index: {}]   ;;  %s1303_s4 = inlined_call_operand.vmem [shape: f32[1,128], index: 4, kind: input, shape index: {}]   ;;  %s1304_s5 = inlined_call_operand.vmem [shape: f32[128,16], index: 5, kind: input, shape index: {}]   ;;  %s1305_s6 = inlined_call_operand.vmem [shape: f32[1,16], index: 6, kind: input, shape index: {}]   ;;  %s1306_s7 = inlined_call_operand.hbm [shape: f32[14,16], index: 7, kind: output, shape index: {}]  }
   0x1   :  { %13 = vsyncpa [#allocation4], 0 }
   0x2   :  { %15 = vsyncpa [#allocation4 + $0x1], 0  ;;  %s1038_s24 = smov 0   ;;  %s1040_s25 = smov 0  }
   0x3   :  { %s1042_s26 = smov 0   ;;  %s1044_s27 = smov 0  }
   0x4 LB: > { %s1059_s28 = sadd.s32 4294967295, %s989_s27   ;;  %s650_s29 = sadd.s32 4294967294, %s989_s27   ;;  %s989_s27 = sphi %s1044_s27, %s1322_s27   ;;  %s985_s26 = sphi %s1042_s26, %s1321_s26   ;;  %s981_s25 = sphi %s1040_s25, %s1320_s25   ;;  %s977_s24 = sphi %s1038_s24, %s1319_s24  }
   0x5   : > { %s1063_s30 = sadd.s32 1, %s989_s27   ;;  %s180_s8 = sadd.s32 1, %s985_s26 }
   0x6   : > { %s177_s9 = ssub.s32 %s989_s27, %s1063_s30  ;;  %p190_p0 = scmp.ne.s32.totalorder %s985_s26, %s981_s25 }
   0x7   : > { %p178_p1 = scmp.eq.s32.totalorder %s177_s9, 0  ;;  %p191_p2 = scmp.eq.s32.totalorder %s1059_s28, 1 }
   0x8   : > { %p196_p3 = scmp.ne.s32.totalorder %s981_s25, %s977_s24  ;;  %p197_p4 = scmp.eq.s32.totalorder %s650_s29, 1 }
   0x9   : > { %s1074_s10 = scalar_select %p178_p1, %s985_s26, %s180_s8  }
   0xa   : > { %p1076_p5 = por %p191_p2, %p190_p0  ;;  %p1080_p6 = por %p197_p4, %p196_p3 }
   0xb   : > { %p651_p7 = scmp.ge.s32.totalorder %s989_s27, 1  ;;  %p204_p8 = scmp.lt.s32.totalorder %s989_s27, 3 }
   0xc   : > { %s1310_s11 = scalar_select %p1076_p5, 1, 0 }
   0xd   : > { %s1311_s12 = scalar_select %p1080_p6, 1, 0 }
   0xe   : > { %p1307_p9 = scmp.eq.s32.totalorder %s1059_s28, 0  ;;  %p1087_p10 = pnand %p651_p7, %p204_p8 }
   0xf   : > { %s991_s14 = smov [#allocation2]   ;;  %s895_s19 = scalar_lea.hbm %s1300_s1, 512 }
  0x10   : > { %s1312_s13 = scalar_select %p1087_p10, 1, 0 }
  0x11   : > { %s216_s15 = sshll.u32 %s991_s14, 4  ;;  %p846_p11 = pneg %p1087_p10  ;;  %s217_s15 = int_to_ptr.vmem [resolvable:$true] %s216_s15 }
  0x12   : > { %p896_p13 = scmp.ne.s32.totalorder %s1300_s1, %s895_s19  ;;  %p902_p3 = scmp.lt.u32.totalorder %s895_s19, %s1300_s1 }
  0x13   : > { %p1095_p12 = pnand %p1307_p9, %p846_p11 }
  0x15   : > { %p897_p0 = pneg %p1095_p12 }
  0x17   : > { %p898_p1 = pnand %p897_p0, %p896_p13 }
  0x19   : > { %p899_p2 = pneg %p898_p1 }
  0x1b   : > { %p904_p4 = pnand %p902_p3, %p899_p2 }
  0x1d   : > { %907 = shalt.err (!%p904_p4)
}
  0x1e   : > { %s908_s29 = scalar_lea.vmem %s217_s15, 512  ;;  %p916_p9 = scmp.lt.s32.totalorder %s217_s15, %s217_s15 }
  0x1f   : > { %p909_p7 = scmp.ne.s32.totalorder %s217_s15, %s908_s29  ;;  %p917_p6 = scmp.lt.s32.totalorder %s908_s29, %s908_s29 }
  0x21   : > { %p911_p8 = pnand %p909_p7, %p897_p0  ;;  %p918_p5 = por %p917_p6, %p916_p9 }
  0x23   : > { %p912_p11 = pneg %p911_p8 }
  0x25   : > { %p919_p10 = pnand %p918_p5, %p912_p11 }
  0x27   : > { %922 = shalt.err (!%p919_p10)
}
  0x28   : > { %s992_s8 = smov 128   ;;  %s993_s9 = smov 8  }
  0x29   : > { %849 = dma.hbm_to_vmem [thread:$0]  (!%p1095_p12), %s1300_s1, 512, %s217_s15, [#allocation3], %s992_s8, %s992_s8, %s993_s9  }
  0x2a   : > { %p1314_p13 = scmp.ne.s32.totalorder %s1312_s13, 0 }
  0x2b   : > { %p1315_p1 = scmp.eq.s32.totalorder (!%p1314_p13), %s1059_s28, 0 }
  0x2c   : > { %254 = sbr.rel (%p1314_p13) target bundleno = 722 (0x2d2), region = 48 }
  0x33   : > { %968 = dma.done.wait (%p1315_p1), [#allocation3], 512   ;;  %p1316_p0 = pmov %p1315_p1 }
  0x34   : > { %p285_p5 = scmp.lt.s32.totalorder %s1059_s28, 1  ;;  %v994_v0 = vmov 0.0|0.0   ;;  %vm995_vm0 = vmmov 0   ;;  %v996_v1 = vmov 0.0   ;;  %v290_v2 = vld [vmem:[#allocation2] sm:$0xff]  ;;  %v291_v3 = vld [vmem:[#allocation2 + $0x8] sm:$0xff] }
  0x35   : > { %970 = vsyncadd (%p1316_p0), [#allocation3], 4294966784  ;;  %786 = vmatprep.subr.bf16.mxu0 %v994_v0  ;;  %713 = vmatprep.mubr.msk.f32.mxu0 %vm995_vm0, %v996_v1  ;;  %v292_v4 = vld [vmem:[#allocation2 + $0x10] sm:$0xff]  ;;  %v787_v5 = vpack.c.bf16 %v291_v3, %v290_v2  ;;  %v293_v6 = vld [vmem:[#allocation2 + $0x18] sm:$0xff]  ;;  %vm301_vm1 = vcmask 261120   ;;  %s663_s22 = sshll.u32 %s1059_s28, 7 }
  0x36   : > { %792 = vmatprep.subr.bf16.mxu1 %v994_v0  ;;  %748 = vmatprep.mubr.msk.f32.mxu1 %vm995_vm0, %v996_v1  ;;  %s286_s13 = scalar_select %p285_p5, %s1059_s28, 1  ;;  %v376_v7 = vld [vmem:[%s1302_s3] sm:$0xff]  ;;  %v377_v8 = vld [vmem:[%s1302_s3 + $0x8] sm:$0xff]  ;;  %v378_v9 = vld [vmem:[%s1302_s3 + $0x10] sm:$0xff]  ;;  %v790_v11 = vpack.c.bf16 %v293_v6, %v292_v4  ;;  %vm563_vm2 = vcmask 130048  }
  0x37   : > { %v379_v10 = vld [vmem:[%s1302_s3 + $0x18] sm:$0xff]  ;;  %788 = vmatpush3.bf16.msra.mxu0 %v787_v5  ;;  %v793_v12 = vpack.c.bf16 %v377_v8, %v376_v7  ;;  %v380_v14 = vld [vmem:[%s1302_s3 + $0x20] sm:$0xff]  ;;  %v381_v15 = vld [vmem:[%s1302_s3 + $0x28] sm:$0xff]  ;;  %p1317_p9 = scmp.ne.s32.totalorder %s1310_s11, 0  ;;  %s997_s28 = smov [#allocation5]  }
  0x38   : > { %s657_s15 = sshll.u32 %s286_s13, 3  ;;  %789 = vmatprep.subr.bf16.mxu0 %v994_v0  ;;  %v796_v13 = vpack.c.bf16 %v379_v10, %v378_v9  ;;  %v799_v17 = vpack.c.bf16 %v381_v15, %v380_v14  ;;  %v382_v18 = vld [vmem:[%s1302_s3 + $0x30] sm:$0xff]  ;;  %v383_v19 = vld [vmem:[%s1302_s3 + $0x38] sm:$0xff]  ;;  %v384_v21 = vld [vmem:[%s1302_s3 + $0x40] sm:$0xff]  ;;  %s927_s16 = sshll.u32 %s997_s28, 4  ;;  %s928_s16 = int_to_ptr.vmem [resolvable:$false] %s927_s16 }
  0x39   : > { %s288_s14 = scalar_lea.vmem %s1299_s0, %s657_s15  ;;  %794 = vmatpush3.bf16.msra.mxu1 %v793_v12  ;;  %v802_v20 = vpack.c.bf16 %v383_v19, %v382_v18  ;;  %v385_v22 = vld [vmem:[%s1302_s3 + $0x48] sm:$0xff]  ;;  %v386_v24 = vld [vmem:[%s1302_s3 + $0x50] sm:$0xff]  ;;  %v387_v25 = vld [vmem:[%s1302_s3 + $0x58] sm:$0xff]  ;;  %s282_s15 = sand.u32 1, %s981_s25  }
  0x3a   : > { %795 = vmatprep.subr.bf16.mxu1 %v994_v0  ;;  %v289_v16 = vld [vmem:[%s288_s14] sm:$0xff]  ;;  %v805_v23 = vpack.c.bf16 %v385_v22, %v384_v21  ;;  %v808_v26 = vpack.c.bf16 %v387_v25, %v386_v24  ;;  %v389_v28 = vld [vmem:[%s1302_s3 + $0x68] sm:$0xff]  ;;  %v390_v30 = vld [vmem:[%s1302_s3 + $0x70] sm:$0xff]  ;;  %s656_s19 = sshll.u32 %s282_s15, 3  ;;  %s1257_s14 = scalar_lea.hbm %s1306_s7, %s663_s22 }
  0x3b   : > { %791 = vmatpush3.bf16.msra.mxu0 %v790_v11  ;;  %v388_v27 = vld [vmem:[%s1302_s3 + $0x60] sm:$0xff]  ;;  %v391_v31 = vld [vmem:[%s1302_s3 + $0x78] sm:$0xff]  ;;  %v471_v34 = vld [vmem:[%s1304_s5 + $0x8] sm:$0xff]  ;;  %s284_s23 = scalar_lea.vmem [#allocation5], %s656_s19  ;;  %s566_s17 = scalar_lea.sflag [#allocation4], %s282_s15 }
  0x3c   : > { %816 = vmatprep.subr.bf16.mxu0 %v994_v0  ;;  %v811_v29 = vpack.c.bf16 %v389_v28, %v388_v27  ;;  %v814_v32 = vpack.c.bf16 %v391_v31, %v390_v30  ;;  %v470_v33 = vld [vmem:[%s1304_s5] sm:$0xff]  ;;  %v472_v35 = vld [vmem:[%s1304_s5 + $0x10] sm:$0xff]  ;;  %v473_v37 = vld [vmem:[%s1304_s5 + $0x18] sm:$0xff]  ;;  %s579_s29 = sshll.u32 %s284_s23, 4  ;;  %s929_s18 = scalar_lea.vmem %s928_s16, 256  ;;  %s1259_s29 = int_to_ptr.vmem [resolvable:$true] %s579_s29 }
  0x3d   : > { %797 = vmatpush3.bf16.msra.mxu1 %v796_v13  ;;  %v817_v36 = vpack.c.bf16 %v471_v34, %v470_v33  ;;  %v820_v38 = vpack.c.bf16 %v473_v37, %v472_v35  ;;  %v474_v39 = vld [vmem:[%s1304_s5 + $0x20] sm:$0xff]  ;;  %v475_v40 = vld [vmem:[%s1304_s5 + $0x28] sm:$0xff]  ;;  %v476_v42 = vld [vmem:[%s1304_s5 + $0x30] sm:$0xff]  ;;  %s923_s13 = scalar_lea.vmem %s1259_s29, 128  ;;  %p930_p2 = scmp.lt.s32.totalorder %s1259_s29, %s928_s16 }
  0x3e   : > { %714 = vmatmul.mubr.msk.f32.vlgmr.msra.gmra.mrb[0].mxu0 %vm301_vm1, %v289_v16  ;;  %798 = vmatprep.subr.bf16.mxu1 %v994_v0  ;;  %v823_v41 = vpack.c.bf16 %v475_v40, %v474_v39  ;;  %v477_v43 = vld [vmem:[%s1304_s5 + $0x38] sm:$0xff]  ;;  %v478_v45 = vld [vmem:[%s1304_s5 + $0x40] sm:$0xff]  ;;  %v479_v46 = vld [vmem:[%s1304_s5 + $0x48] sm:$0xff]  ;;  %p924_p6 = scmp.ne.s32.totalorder %s1259_s29, %s923_s13  ;;  %p931_p3 = scmp.lt.s32.totalorder %s929_s18, %s923_s13 }
  0x3f   : > { %783 = vmatprep.mubr.msk.f32.mxu0 %vm995_vm0, %v996_v1  ;;  %818 = vmatpush3.bf16.msra.mxu0 %v817_v36  ;;  %v826_v44 = vpack.c.bf16 %v477_v43, %v476_v42  ;;  %v829_v47 = vpack.c.bf16 %v479_v46, %v478_v45  ;;  %v480_v48 = vld [vmem:[%s1304_s5 + $0x50] sm:$0xff]  ;;  %v481_v49 = vld [vmem:[%s1304_s5 + $0x58] sm:$0xff]  ;;  %v482_v51 = vld [vmem:[%s1304_s5 + $0x60] sm:$0xff] }
  0x40   : > { %819 = vmatprep.subr.bf16.mxu0 %v994_v0  ;;  %v832_v50 = vpack.c.bf16 %v481_v49, %v480_v48  ;;  %v483_v52 = vld [vmem:[%s1304_s5 + $0x68] sm:$0xff]  ;;  %v658_v54 = vld [vmem:[%s1301_s2] ss:$0 sm:$0xff]  ;;  %v484_v59 = vld [vmem:[%s1304_s5 + $0x70] sm:$0xff]  ;;  %p925_p10 = pnand %p924_p6, %p1317_p9  ;;  %p932_p4 = por %p931_p3, %p930_p2 }
  0x41   : > { %800 = vmatpush3.bf16.msra.mxu1 %v799_v17  ;;  %v835_v53 = vpack.c.bf16 %v483_v52, %v482_v51  ;;  %v485_v60 = vld [vmem:[%s1304_s5 + $0x78] sm:$0xff]  ;;  %v660_v62 = vld [vmem:[%s1303_s4] ss:$0 sm:$0xff] }
  0x42   : > { %801 = vmatprep.subr.bf16.mxu1 %v994_v0  ;;  %v838_v61 = vpack.c.bf16 %v485_v60, %v484_v59  ;;  %v661_v3 = vld [vmem:[%s1305_s6] ss:$0 sm:$0xff]  ;;  %p926_p12 = pneg %p925_p10 }
  0x43   : > { %821 = vmatpush3.bf16.msra.mxu0 %v820_v38 }
  0x44   : > { %822 = vmatprep.subr.bf16.mxu0 %v994_v0  ;;  %p933_p7 = pnand %p932_p4, %p926_p12 }
  0x45   : > { %803 = vmatpush3.bf16.msra.mxu1 %v802_v20 }
  0x46   : > { %804 = vmatprep.subr.bf16.mxu1 %v994_v0 }
  0x47   : > { %824 = vmatpush3.bf16.msra.mxu0 %v823_v41 }
  0x48   : > { %825 = vmatprep.subr.bf16.mxu0 %v994_v0 }
  0x49   : > { %806 = vmatpush3.bf16.msra.mxu1 %v805_v23 }
  0x4a   : > { %807 = vmatprep.subr.bf16.mxu1 %v994_v0 }
  0x4b   : > { %827 = vmatpush3.bf16.msra.mxu0 %v826_v44 }
  0x4c   : > { %828 = vmatprep.subr.bf16.mxu0 %v994_v0 }
  0x4d   : > { %809 = vmatpush3.bf16.msra.mxu1 %v808_v26 }
  0x4e   : > { %810 = vmatprep.subr.bf16.mxu1 %v994_v0 }
  0x4f   : > { %830 = vmatpush3.bf16.msra.mxu0 %v829_v47 }
  0x50   : > { %831 = vmatprep.subr.bf16.mxu0 %v994_v0 }
  0x51   : > { %812 = vmatpush3.bf16.msra.mxu1 %v811_v29 }
  0x52   : > { %813 = vmatprep.subr.bf16.mxu1 %v994_v0 }
  0x53   : > { %833 = vmatpush3.bf16.msra.mxu0 %v832_v50 }
  0x54   : > { %834 = vmatprep.subr.bf16.mxu0 %v994_v0 }
  0x55   : > { %815 = vmatpush3.bf16.msra.mxu1 %v814_v32 }
  0x57   : > { %836 = vmatpush3.bf16.msra.mxu0 %v835_v53 }
  0x58   : > { %837 = vmatprep.subr.bf16.mxu0 %v994_v0 }
  0x5b   : > { %839 = vmatpush3.bf16.msra.mxu0 %v838_v61 }
 0x111   : > { %v371_v55 = vpop.f32.mrb[0].mxu0 }
 0x112   : > { %v372_v56 = vadd.f32 %v658_v54, %v371_v55  ;;  %v715_v57 = vpop.f32.mrb[1].mxu0 }
 0x114   : > { %v375_v58 = vmax.f32 %v372_v56, 0.0 }
 0x116   : > { %749 = vmatmul.mubr.f32.vlgmr.msra.gmra.mrb[0].mxu1 %v375_v58 }
 0x1e9   : > { %v465_v63 = vpop.f32.mrb[0].mxu1 }
 0x1ea   : > { %v466_v0 = vadd.f32 %v660_v62, %v465_v63  ;;  %v750_v1 = vpop.f32.mrb[1].mxu1 }
 0x1ec   : > { %v469_v2 = vmax.f32 %v466_v0, 0.0 }
 0x1ee   : > { %784 = vmatmul.mubr.f32.vlgmr.msra.gmra.mrb[2].mxu0 %v469_v2 }
 0x2c1   : > { %v559_v4 = vpop.f32.mrb[2].mxu0 }
 0x2c2   : > { %v560_v5 = vadd.f32 %v661_v3, %v559_v4  ;;  %v785_v6 = vpop.f32.mrb[3].mxu0 }
 0x2c4   : > { %564 = vst.msk [vmem:[%s284_s23] sm:$0xff] %vm563_vm2, %v560_v5 }
 0x2c5   : > { %936 = shalt.err (!%p933_p7)
}
 0x2c6   : > { %s937_s15 = scalar_lea.hbm %s1257_s14, 128  ;;  %s941_s21 = scalar_lea.hbm %s1306_s7, 256 }
 0x2c7   : > { %p938_p8 = scmp.ne.s32.totalorder %s1257_s14, %s937_s15  ;;  %p942_p1 = scmp.lt.u32.totalorder %s1257_s14, %s1306_s7 }
 0x2c8   : > { %p943_p0 = scmp.lt.u32.totalorder %s941_s21, %s937_s15  ;;  %p945_p6 = scmp.lt.u32.totalorder %s937_s15, %s1257_s14 }
 0x2c9   : > { %p939_p11 = pnand %p938_p8, %p1317_p9 }
 0x2ca   : > { %p944_p5 = por %p943_p0, %p942_p1 }
 0x2cb   : > { %p940_p13 = pneg %p939_p11 }
 0x2cc   : > { %p946_p10 = por %p945_p6, %p944_p5 }
 0x2ce   : > { %p947_p12 = pnand %p946_p10, %p940_p13 }
 0x2d0   : > { %950 = shalt.err (!%p947_p12)
}
 0x2d1   : > { %844 = dma.vmem_to_hbm [thread:$0]  (%p1317_p9), %s1259_s29, 128, %s1257_s14, %s566_s17  }
 0x2d2 PF: > { %p856_p2 = scmp.ge.s32.totalorder %s989_s27, 2  ;;  %s591_s8 = sand.u32 1, %s977_s24  }
 0x2d3   : > { %p1318_p3 = scmp.ne.s32.totalorder %s1311_s12, 0  ;;  %s592_s9 = scalar_lea.sflag [#allocation4], %s591_s8 }
 0x2d5   : > { %p851_p4 = pnand %p856_p2, %p1318_p3 }
 0x2d7   : > { %972 = dma.done.wait (!%p851_p4), %s592_s9, 128  }
 0x2d8   : > { %974 = vsyncadd (!%p851_p4), %s592_s9, 4294967168  ;;  %p18_p7 = scmp.ge.s32.totalorder %s1063_s30, 4   ;;  %s1319_s24 = smov %s981_s25 }
 0x2d9   : > { %s1320_s25 = smov %s985_s26  ;;  %s1321_s26 = smov %s1074_s10 }
 0x2da   : > { %s1322_s27 = smov %s1063_s30  ;;  %20 = sbr.rel (!%p18_p7) target bundleno = 4 (0x4), region = 88 }
 0x2e1   :  { %597 = vsyncpa [#allocation3], 1 }
 0x2e2   :  { %599 = vsyncpa [#allocation3 + $0x1], 1 }
 0x2e3   :  { %600 = vsyncpa [#allocation4], 1 }
 0x2e4   :  { %602 = vsyncpa [#allocation4 + $0x1], 1 }

</bundles_post_ra>
